<compile_context>
chip_gen: v6e
topology: v6e:2x2x1
jax: 0.10.0
libtpu: 0.0.40
codegen_flags: <defaults>
</compile_context>

<pallas_src>
import functools
import numpy as np
import jax
import jax.numpy as jnp
from jax.experimental import pallas as pl
from jax.experimental.pallas import tpu as pltpu

BN_EPS = 1e-5
KT_MAX = 2048   # max K tile; with bf16 weights this fits scoped VMEM on v5e/v6e/v7x
NT_MAX = 256    # Cout tile -> parallel grid axis (uses 2nd TensorCore on v7x)


def _round_up(x, m):
    return (x + m - 1) // m * m


def _cdiv(a, b):
    return -(-a // b)


# ---------------------------- Pallas kernels ----------------------------

def _mm_affine_kernel(a_ref, b_ref, scale_ref, shift_ref, *rest,
                      activation, has_residual):
    """out = act((A @ B) * scale + shift [+ residual]); grid = (N tiles, K tiles)."""
    if has_residual:
        res_ref, o_ref, acc_ref = rest
    else:
        o_ref, acc_ref = rest
    k = pl.program_id(1)

    @pl.when(k == 0)
    def _():
        acc_ref[...] = jnp.zeros_like(acc_ref)

    acc_ref[...] += jnp.dot(a_ref[...], b_ref[...],
                            preferred_element_type=jnp.float32)

    @pl.when(k == pl.num_programs(1) - 1)
    def _():
        y = acc_ref[...] * scale_ref[...] + shift_ref[...]
        if has_residual:
            y = y + res_ref[...]
        if activation == "relu":
            y = jnp.maximum(y, 0.0)
        o_ref[...] = y.astype(o_ref.dtype)


def _max9_kernel(*refs):
    # refs = 9 window-tap inputs + output; elementwise max over the taps.
    o_ref = refs[-1]
    m = refs[0][...]
    for r in refs[1:-1]:
        m = jnp.maximum(m, r[...])
    o_ref[...] = m


def _mean_reduce_kernel(x_ref, o_ref):
    # x: (N, S, C) -> global average over spatial S
    o_ref[...] = jnp.mean(x_ref[...], axis=1)


# ---------------------------- Pallas wrappers ----------------------------

def matmul_prepped(a, prep, activation="none", residual=None):
    """act((a @ W) * scale + shift [+ residual]) with pre-padded bf16 weights."""
    M, K = a.shape
    assert K == prep["K"]
    N = prep["N"]
    Kp, Np = prep["b"].shape
    kt = prep["kt"]
    nk = Kp // kt
    nt = min(Np, NT_MAX)
    nn = Np // nt
    Mp = _round_up(max(M, 8), 8)

    a_p = jnp.zeros((Mp, Kp), jnp.bfloat16).at[:M, :K].set(a.astype(jnp.bfloat16))
    inputs = [a_p, prep["b"], prep["scale"], prep["shift"]]
    in_specs = [
        pl.BlockSpec((Mp, kt), lambda j, k: (0, k)),
        pl.BlockSpec((kt, nt), lambda j, k: (k, j)),
        pl.BlockSpec((1, nt), lambda j, k: (0, j)),
        pl.BlockSpec((1, nt), lambda j, k: (0, j)),
    ]
    has_res = residual is not None
    if has_res:
        r_p = jnp.zeros((Mp, Np), jnp.float32).at[:M, :N].set(
            residual.astype(jnp.float32))
        inputs.append(r_p)
        in_specs.append(pl.BlockSpec((Mp, nt), lambda j, k: (0, j)))

    out = pl.pallas_call(
        functools.partial(_mm_affine_kernel, activation=activation,
                          has_residual=has_res),
        out_shape=jax.ShapeDtypeStruct((Mp, Np), jnp.float32),
        grid_spec=pltpu.PrefetchScalarGridSpec(
            num_scalar_prefetch=0,
            grid=(nn, nk),
            in_specs=in_specs,
            out_specs=pl.BlockSpec((Mp, nt), lambda j, k: (0, j)),
            scratch_shapes=[pltpu.VMEM((Mp, nt), jnp.float32)],
        ),
        compiler_params=pltpu.CompilerParams(
            dimension_semantics=("parallel", "arbitrary")),
    )(*inputs)
    return out[:M, :N]


def maxpool_1x3x3_s2(x):
    """MaxPool3d((1,3,3), stride=(1,2,2), padding=(0,1,1)) on NDHWC."""
    N, D, H, W, C = x.shape
    Ho = (H + 2 - 3) // 2 + 1
    Wo = (W + 2 - 3) // 2 + 1
    neg = jnp.finfo(x.dtype).min
    xp = jnp.pad(x, ((0, 0), (0, 0), (1, 1), (1, 1), (0, 0)),
                 constant_values=neg)
    M = N * D * Ho * Wo
    flat = M * C
    # lane-dense view for the elementwise max (max is elementwise over taps,
    # so any consistent reshape is valid)
    shape2 = (flat // 128, 128) if flat % 128 == 0 else (M, C)
    taps = []
    for hk in range(3):
        for wk in range(3):
            t = xp[:, :, hk:hk + 2 * (Ho - 1) + 1:2,
                   wk:wk + 2 * (Wo - 1) + 1:2, :]
            taps.append(t.reshape(shape2))
    out = pl.pallas_call(
        _max9_kernel,
        out_shape=jax.ShapeDtypeStruct(shape2, x.dtype),
    )(*taps)
    return out.reshape(N, D, Ho, Wo, C)


def global_avgpool(x):
    """AdaptiveAvgPool3d((1,1,1)) + flatten on NDHWC -> (N, C)."""
    N, D, H, W, C = x.shape
    xr = x.reshape(N, D * H * W, C)
    return pl.pallas_call(
        _mean_reduce_kernel,
        out_shape=jax.ShapeDtypeStruct((N, C), x.dtype),
    )(xr)


# ---------------------------- init-time weight prep ----------------------------

def _fold_bn(bn, conv_bias=None):
    scale = bn["gamma"] / jnp.sqrt(bn["var"] + BN_EPS)
    b = conv_bias if conv_bias is not None else 0.0
    shift = (b - bn["mean"]) * scale + bn["beta"]
    return scale, shift


def _prep_matmul(wmat, scale, shift):
    """Pad / cast a (K, N) weight matrix once at init (bf16, tiled K, padded N)."""
    K, N = wmat.shape
    Kp128 = _round_up(max(K, 128), 128)
    nk = _cdiv(Kp128, KT_MAX)
    kt = _round_up(_cdiv(Kp128, nk), 128)      # balanced K tiles, minimal padding
    Kp = kt * nk
    Np = _round_up(max(N, 128), 128)
    b = jnp.zeros((Kp, Np), jnp.bfloat16).at[:K, :N].set(
        wmat.astype(jnp.bfloat16))
    s = jnp.zeros((1, Np), jnp.float32).at[0, :N].set(scale)
    sh = jnp.zeros((1, Np), jnp.float32).at[0, :N].set(shift)
    return {"b": b, "scale": s, "shift": sh,
            "K": int(K), "N": int(N), "kt": int(kt)}


def _prep_conv(w, conv_bias, bn, stride_hw, pad_dhw):
    """Fold BN into the conv and pre-bake the (K, Cout) bf16 matmul weights."""
    Cout, Cin, kd, kh, kw = w.shape
    wmat = jnp.transpose(w, (2, 3, 4, 1, 0)).reshape(kd * kh * kw * Cin, Cout)
    scale, shift = _fold_bn(bn, conv_bias)
    p = _prep_matmul(wmat, scale, shift)
    p.update({"ksize": (kd, kh, kw), "cin": int(Cin), "cout": int(Cout),
              "stride": int(stride_hw), "pad": tuple(pad_dhw)})
    return p


# ---------------------------- conv glue ----------------------------

def conv_bn_act(x, prep, activation="none", residual=None):
    """Conv3d (stride (1,s,s)) + folded BN (+ residual) + activation via Pallas."""
    N, D, H, W, Cin = x.shape
    kd, kh, kw = prep["ksize"]
    sd, sh_, sw = 1, prep["stride"], prep["stride"]
    pd, ph, pw = prep["pad"]
    xp = jnp.pad(x, ((0, 0), (pd, pd), (ph, ph), (pw, pw), (0, 0)))
    Do = (D + 2 * pd - kd) // sd + 1
    Ho = (H + 2 * ph - kh) // sh_ + 1
    Wo = (W + 2 * pw - kw) // sw + 1
    cols = []
    for dk in range(kd):
        for hk in range(kh):
            for wk in range(kw):
                cols.append(xp[:, dk:dk + sd * (Do - 1) + 1:sd,
                               hk:hk + sh_ * (Ho - 1) + 1:sh_,
                               wk:wk + sw * (Wo - 1) + 1:sw, :])
    patches = jnp.concatenate(cols, axis=-1).reshape(
        N * Do * Ho * Wo, kd * kh * kw * Cin)
    res2 = None
    if residual is not None:
        res2 = residual.reshape(N * Do * Ho * Wo, prep["cout"])
    y = matmul_prepped(patches, prep, activation, res2)
    return y.reshape(N, Do, Ho, Wo, prep["cout"])


# ---------------------------- model ----------------------------

def _init_conv(key, cout, cin, kd, kh, kw):
    fan_in = cin * kd * kh * kw
    return jax.random.normal(key, (cout, cin, kd, kh, kw),
                             jnp.float32) * np.sqrt(2.0 / fan_in)


def _init_bn(c):
    return {"gamma": jnp.ones((c,), jnp.float32),
            "beta": jnp.zeros((c,), jnp.float32),
            "mean": jnp.zeros((c,), jnp.float32),
            "var": jnp.ones((c,), jnp.float32)}


def init_model(key):
    keys = iter(jax.random.split(key, 256))
    params = {}
    # stem: Conv3d(1, 64, (3,7,7), stride=(1,2,2), padding=(1,3,3), bias=True)
    w = _init_conv(next(keys), 64, 1, 3, 7, 7)
    b = jax.random.normal(next(keys), (64,), jnp.float32) * 0.01
    params["stem"] = _prep_conv(w, b, _init_bn(64), stride_hw=2, pad_dhw=(1, 3, 3))

    inplanes = 64
    layer_cfg = [(64, 3, 1), (128, 4, 1), (256, 6, 2), (512, 3, 2)]
    layers = []
    for planes, nblocks, stride in layer_cfg:
        blocks = []
        for bi in range(nblocks):
            s = stride if bi == 0 else 1
            need_down = (bi == 0) and (s != 1 or inplanes != planes)
            blk = {
                "conv1": _prep_conv(
                    _init_conv(next(keys), planes, inplanes, 3, 3, 3),
                    None, _init_bn(planes), s, (1, 1, 1)),
                "conv2": _prep_conv(
                    _init_conv(next(keys), planes, planes, 3, 3, 3),
                    None, _init_bn(planes), 1, (1, 1, 1)),
            }
            if need_down:
                blk["down"] = _prep_conv(
                    _init_conv(next(keys), planes, inplanes, 1, 1, 1),
                    None, _init_bn(planes), s, (0, 0, 0))
            blocks.append(blk)
            inplanes = planes
        layers.append(blocks)
    params["layers"] = layers

    # 8 FC heads, concatenated into one matmul
    head_dims = [("modic", 4), ("up_endplate", 2), ("low_endplate", 2),
                 ("spondy", 2), ("hern", 2), ("narrow", 2), ("bulge", 2),
                 ("pfirrman", 5)]
    ws, bs = [], []
    for _, d in head_dims:
        kw_, kb_ = jax.random.split(next(keys))
        ws.append(jax.random.normal(kw_, (d, 512), jnp.float32) *
                  np.sqrt(1.0 / 512))
        bs.append(jax.random.normal(kb_, (d,), jnp.float32) * 0.01)
    head_w = jnp.concatenate(ws, axis=0).T    # (512, 21)
    head_b = jnp.concatenate(bs, axis=0)      # (21,)
    nout = head_b.shape[0]
    params["head"] = _prep_matmul(head_w, jnp.ones((nout,), jnp.float32), head_b)
    params["head_dims"] = head_dims
    return params


def basic_block(x, p):
    if "down" in p:
        identity = conv_bn_act(x, p["down"], "none")
    else:
        identity = x
    out = conv_bn_act(x, p["conv1"], "relu")
    # conv2 + BN + residual add + ReLU fused into the matmul epilogue
    out = conv_bn_act(out, p["conv2"], "relu", residual=identity)
    return out


def forward(params, x):
    # x: (N, D, H, W, 1)
    x = conv_bn_act(x, params["stem"], "relu")
    x = maxpool_1x3x3_s2(x)
    for blocks in params["layers"]:
        for blk in blocks:
            x = basic_block(x, blk)
    feat = global_avgpool(x)                        # (N, 512)
    logits = matmul_prepped(feat, params["head"], "none")
    outs, off = [], 0
    for _, d in params["head_dims"]:
        outs.append(logits[:, off:off + d])
        off += d
    return tuple(outs)


if __name__ == "__main__":
    root = jax.random.PRNGKey(0)
    pkey, xkey = jax.random.split(root)
    params = init_model(pkey)
    # equivalent PyTorch input: (2, 1, 4, 16, 16) NCDHW -> here NDHWC
    x = jax.random.normal(xkey, (2, 4, 16, 16, 1), jnp.float32)
    outs = jax.block_until_ready(forward(params, x))
    expected = [(2, 4), (2, 2), (2, 2), (2, 2), (2, 2), (2, 2), (2, 2), (2, 5)]
    assert [tuple(o.shape) for o in outs] == expected
    assert all(bool(jnp.all(jnp.isfinite(o))) for o in outs)
    print("KERNEL_OK")
</pallas_src>

<mosaic_0001>
module attributes {stable_mosaic.version = 11 : i64} {
  func.func @_mm_affine_kernel(%arg0: i32, %arg1: i32, %arg2: memref<512x256xbf16, #tpu.memory_space<vmem>>, %arg3: memref<256x128xbf16, #tpu.memory_space<vmem>>, %arg4: memref<1x128xf32, #tpu.memory_space<vmem>>, %arg5: memref<1x128xf32, #tpu.memory_space<vmem>>, %arg6: memref<512x128xf32, #tpu.memory_space<vmem>>, %arg7: memref<512x128xf32, #tpu.memory_space<vmem>>) attributes {dimension_semantics = [#tpu.dimension_semantics<parallel>, #tpu.dimension_semantics<arbitrary>], iteration_bounds = array<i64: 1, 1>, scalar_prefetch = 0 : i64, scratch_operands = 1 : i64, tpu.core_type = #tpu.core_type<tc>, window_params = [{transform_indices = @transform_0, window_bounds = array<i64: 512, 256>}, {transform_indices = @transform_1, window_bounds = array<i64: 256, 128>}, {transform_indices = @transform_2, window_bounds = array<i64: 1, 128>}, {transform_indices = @transform_3, window_bounds = array<i64: 1, 128>}, {transform_indices = @transform_4, window_bounds = array<i64: 512, 128>}]} {
    %c0_i32 = arith.constant 0 : i32
    %0 = arith.cmpi eq, %arg1, %c0_i32 : i32
    %1 = arith.extui %0 : i1 to i32
    %c0_i32_0 = arith.constant 0 : i32
    %2 = arith.cmpi ne, %1, %c0_i32_0 : i32
    scf.if %2 {
      %cst_10 = arith.constant 0.000000e+00 : f32
      %12 = vector.broadcast %cst_10 : f32 to vector<512x128xf32>
      %c0_11 = arith.constant 0 : index
      %c0_12 = arith.constant 0 : index
      %13 = vector.load %arg7[%c0_11, %c0_12] : memref<512x128xf32, #tpu.memory_space<vmem>>, vector<512x128xf32>
      tpu.vector_store %arg7[%c0_11, %c0_12], %12 {strides = array<i32>} : memref<512x128xf32, #tpu.memory_space<vmem>>, vector<512x128xf32>,
    } else {
    }
    %c0 = arith.constant 0 : index
    %c0_1 = arith.constant 0 : index
    %3 = vector.load %arg7[%c0, %c0_1] : memref<512x128xf32, #tpu.memory_space<vmem>>, vector<512x128xf32>
    %c0_2 = arith.constant 0 : index
    %c0_3 = arith.constant 0 : index
    %4 = vector.load %arg2[%c0_2, %c0_3] : memref<512x256xbf16, #tpu.memory_space<vmem>>, vector<512x256xbf16>
    %c0_4 = arith.constant 0 : index
    %c0_5 = arith.constant 0 : index
    %5 = vector.load %arg3[%c0_4, %c0_5] : memref<256x128xbf16, #tpu.memory_space<vmem>>, vector<256x128xbf16>
    %cst = arith.constant dense<0.000000e+00> : vector<512x128xf32>
    %6 = tpu.matmul %4, %5, %cst {dimension_numbers = #tpu.dot_dimension_numbers<[1], [0], [0], [1], [0, 0, 1, 1], [], []>} : vector<512x256xbf16>, vector<256x128xbf16>, vector<512x128xf32> -> vector<512x128xf32>
    %7 = arith.addf %3, %6 : vector<512x128xf32>
    %c0_6 = arith.constant 0 : index
    %c0_7 = arith.constant 0 : index
    %8 = vector.load %arg7[%c0_6, %c0_7] : memref<512x128xf32, #tpu.memory_space<vmem>>, vector<512x128xf32>
    tpu.vector_store %arg7[%c0_6, %c0_7], %7 {strides = array<i32>} : memref<512x128xf32, #tpu.memory_space<vmem>>, vector<512x128xf32>,
    %c0_i32_8 = arith.constant 0 : i32
    %9 = arith.cmpi eq, %arg1, %c0_i32_8 : i32
    %10 = arith.extui %9 : i1 to i32
    %c0_i32_9 = arith.constant 0 : i32
    %11 = arith.cmpi ne, %10, %c0_i32_9 : i32
    scf.if %11 {
      %c0_10 = arith.constant 0 : index
      %c0_11 = arith.constant 0 : index
      %12 = vector.load %arg7[%c0_10, %c0_11] : memref<512x128xf32, #tpu.memory_space<vmem>>, vector<512x128xf32>
      %c0_12 = arith.constant 0 : index
      %c0_13 = arith.constant 0 : index
      %13 = vector.load %arg4[%c0_12, %c0_13] : memref<1x128xf32, #tpu.memory_space<vmem>>, vector<1x128xf32>
      %14 = vector.broadcast %13 : vector<1x128xf32> to vector<512x128xf32>
      %15 = arith.mulf %12, %14 : vector<512x128xf32>
      %c0_14 = arith.constant 0 : index
      %c0_15 = arith.constant 0 : index
      %16 = vector.load %arg5[%c0_14, %c0_15] : memref<1x128xf32, #tpu.memory_space<vmem>>, vector<1x128xf32>
      %17 = vector.broadcast %16 : vector<1x128xf32> to vector<512x128xf32>
      %18 = arith.addf %15, %17 : vector<512x128xf32>
      %cst_16 = arith.constant 0.000000e+00 : f32
      %19 = vector.broadcast %cst_16 : f32 to vector<512x128xf32>
      %20 = arith.maximumf %18, %19 : vector<512x128xf32>
      %c0_17 = arith.constant 0 : index
      %c0_18 = arith.constant 0 : index
      %21 = vector.load %arg6[%c0_17, %c0_18] : memref<512x128xf32, #tpu.memory_space<vmem>>, vector<512x128xf32>
      tpu.vector_store %arg6[%c0_17, %c0_18], %20 {strides = array<i32>} : memref<512x128xf32, #tpu.memory_space<vmem>>, vector<512x128xf32>,
    } else {
    }
    return
  }
  func.func @transform_0(%arg0: i32, %arg1: i32) -> (i32, i32) {
    %c0_i32 = arith.constant 0 : i32
    %c0_i32_0 = arith.constant 0 : i32
    return %c0_i32, %arg1 : i32, i32
  }
  func.func @transform_1(%arg0: i32, %arg1: i32) -> (i32, i32) {
    %c0_i32 = arith.constant 0 : i32
    return %arg1, %arg0 : i32, i32
  }
  func.func @transform_2(%arg0: i32, %arg1: i32) -> (i32, i32) {
    %c0_i32 = arith.constant 0 : i32
    %c0_i32_0 = arith.constant 0 : i32
    return %c0_i32, %arg0 : i32, i32
  }
  func.func @transform_3(%arg0: i32, %arg1: i32) -> (i32, i32) {
    %c0_i32 = arith.constant 0 : i32
    %c0_i32_0 = arith.constant 0 : i32
    return %c0_i32, %arg0 : i32, i32
  }
  func.func @transform_4(%arg0: i32, %arg1: i32) -> (i32, i32) {
    %c0_i32 = arith.constant 0 : i32
    %c0_i32_0 = arith.constant 0 : i32
    return %c0_i32, %arg0 : i32, i32
  }
}

</mosaic_0001>

<bundles_post_ra>
// kernel: tpu_custom_call.1
= control target key start
LH: loop header
LB: loop body
LE: loop exit
PB: predicated region body
PF: predicated region fallthrough
CT: control target
= control target key end

     0   :  { %9 = vsyncpa [#allocation4], 0  ;;  %s1981_s0 = inlined_call_operand.hbm [shape: bf16[512,256], index: 0, kind: input, shape index: {}]   ;;  %s1982_s1 = inlined_call_operand.hbm [shape: bf16[256,128], index: 1, kind: input, shape index: {}]   ;;  %s1983_s2 = inlined_call_operand.vmem [shape: f32[1,128], index: 2, kind: input, shape index: {}]   ;;  %s1984_s3 = inlined_call_operand.vmem [shape: f32[1,128], index: 3, kind: input, shape index: {}]   ;;  %s1985_s4 = inlined_call_operand.hbm [shape: f32[512,128], index: 4, kind: output, shape index: {}]  }
   0x1   :  { %10 = vsyncpa [#allocation7], 0 }
   0x2   :  { %11 = vsyncpa [#allocation5], 0  ;;  %s1763_s15 = smov [#allocation3]  }
   0x3   :  { %s17_s16 = sshll.u32 %s1763_s15, 4  ;;  %s18_s16 = int_to_ptr.vmem [resolvable:$true] %s17_s16 }
   0x4   :  { %s1705_s17 = scalar_lea.vmem %s18_s16, 8192  ;;  %p1710_p1 = scmp.lt.s32.totalorder %s18_s16, %s18_s16 }
   0x5   :  { %p1706_p0 = scmp.ne.s32.totalorder %s18_s16, %s1705_s17  ;;  %p1711_p2 = scmp.lt.s32.totalorder %s1705_s17, %s1705_s17 }
   0x7   :  { %p1712_p3 = por %p1711_p2, %p1710_p1 }
   0x9   :  { %p1713_p4 = pnand %p1712_p3, %p1706_p0 }
   0xb   :  { %1716 = shalt.err (!%p1713_p4)
}
   0xc   :  { %s1764_s18 = smov 128   ;;  %s1765_s19 = smov 8  }
   0xd   :  { %23 = dma.hbm_to_vmem [thread:$0]  %s1981_s0, 8192, %s18_s16, [#allocation4], %s1764_s18, %s1764_s18, %s1765_s19  }
   0xe   :  { %s1766_s22 = smov [#allocation6]  }
   0xf   :  { %s29_s23 = sshll.u32 %s1766_s22, 4  ;;  %s30_s23 = int_to_ptr.vmem [resolvable:$true] %s29_s23 }
  0x10   :  { %s1725_s24 = scalar_lea.vmem %s30_s23, 2048  ;;  %p1730_p6 = scmp.lt.s32.totalorder %s30_s23, %s30_s23 }
  0x11   :  { %p1726_p5 = scmp.ne.s32.totalorder %s30_s23, %s1725_s24  ;;  %p1731_p7 = scmp.lt.s32.totalorder %s1725_s24, %s1725_s24 }
  0x13   :  { %p1732_p8 = por %p1731_p7, %p1730_p6 }
  0x15   :  { %p1733_p9 = pnand %p1732_p8, %p1726_p5 }
  0x17   :  { %1736 = shalt.err (!%p1733_p9)
}
  0x18   :  { %s1767_s25 = smov 64   ;;  %s1768_s26 = smov 4  }
  0x19   :  { %35 = dma.hbm_to_vmem [thread:$0]  %s1982_s1, 2048, %s30_s23, [#allocation7], %s1767_s25, %s1767_s25, %s1768_s26  }
  0x1a   :  { %1757 = dma.done.wait [#allocation4], 8192  }
  0x1b   :  { %1758 = vsyncadd [#allocation4], 4294959104 }
  0x1c   :  { %1759 = dma.done.wait [#allocation7], 2048  }
  0x1d   :  { %1760 = vsyncadd [#allocation7], 4294965248  ;;  %v1769_v0 = vmov 0   ;;  %v1585_v1 = vld [vmem:[#allocation6 + $0x38] sm:$0xff]   ;;  %v1586_v2 = vld [vmem:[#allocation6 + $0x30] sm:$0xff]  }
  0x1e   :  { %691 = vmatprep.subr.bf16.mxu0 %v1769_v0  ;;  %1545 = vmatprep.subr.bf16.mxu1 %v1769_v0  ;;  %v1587_v3 = vld [vmem:[#allocation6 + $0x28] sm:$0xff]   ;;  %v1588_v4 = vld [vmem:[#allocation6 + $0x20] sm:$0xff]   ;;  %v1589_v5 = vld [vmem:[#allocation6 + $0x18] sm:$0xff]  }
  0x1f   :  { %692 = vmatpush1.bf16.msra.mxu0 %v1585_v1  ;;  %1561 = vmatpush1.bf16.msra.mxu1 %v1585_v1  ;;  %v1603_v6 = vld [vmem:[#allocation3 + $0x4] ss:$8 sps:$4 sm:$0xff]   ;;  %v1590_v7 = vld [vmem:[#allocation6 + $0x10] sm:$0xff]   ;;  %v1593_v11 = vld [vmem:[#allocation6 + $0x78] sm:$0xff]  }
  0x20   :  { %693 = vmatprep.subr.bf16.mxu0 %v1769_v0  ;;  %1546 = vmatprep.subr.bf16.mxu1 %v1769_v0  ;;  %v1606_v8 = vld [vmem:[#allocation3 + $0x104] ss:$8 sps:$4 sm:$0xff]   ;;  %v1594_v12 = vld [vmem:[#allocation6 + $0x70] sm:$0xff]   ;;  %v1597_v15 = vld [vmem:[#allocation6 + $0x58] sm:$0xff]  }
  0x21   :  { %723 = vmatprep.mubr.bf16.mxu0 %v1603_v6  ;;  %851 = vmatprep.mubr.bf16.mxu1 %v1606_v8  ;;  %v1591_v9 = vld [vmem:[#allocation6 + $0x8] sm:$0xff]   ;;  %v1592_v10 = vld [vmem:[#allocation6] sm:$0xff]   ;;  %v1598_v16 = vld [vmem:[#allocation6 + $0x50] sm:$0xff]  }
  0x22   :  { %v1595_v13 = vld [vmem:[#allocation6 + $0x68] sm:$0xff]   ;;  %v1596_v14 = vld [vmem:[#allocation6 + $0x60] sm:$0xff]   ;;  %v1607_v21 = vld [vmem:[#allocation3 + $0x14] ss:$8 sps:$4 sm:$0xff]  }
  0x23   :  { %694 = vmatpush1.bf16.msra.mxu0 %v1586_v2  ;;  %1562 = vmatpush1.bf16.msra.mxu1 %v1586_v2  ;;  %v1599_v17 = vld [vmem:[#allocation6 + $0x48] sm:$0xff]   ;;  %v1600_v18 = vld [vmem:[#allocation6 + $0x40] sm:$0xff]   ;;  %v1609_v22 = vld [vmem:[#allocation3 + $0x114] ss:$8 sps:$4 sm:$0xff]  }
  0x24   :  { %695 = vmatprep.subr.bf16.mxu0 %v1769_v0  ;;  %1547 = vmatprep.subr.bf16.mxu1 %v1769_v0  ;;  %v1601_v19 = vld [vmem:[#allocation3] ss:$8 sps:$4 sm:$0xff]   ;;  %v1611_v23 = vld [vmem:[#allocation3 + $0x10] ss:$8 sps:$4 sm:$0xff]   ;;  %v1613_v25 = vld [vmem:[#allocation3 + $0x24] ss:$8 sps:$4 sm:$0xff]  }
  0x25   :  { %v1604_v20 = vld [vmem:[#allocation3 + $0x100] ss:$8 sps:$4 sm:$0xff]   ;;  %v1612_v24 = vld [vmem:[#allocation3 + $0x110] ss:$8 sps:$4 sm:$0xff]   ;;  %v1615_v26 = vld [vmem:[#allocation3 + $0x124] ss:$8 sps:$4 sm:$0xff]  }
  0x26   :  { %v1617_v27 = vld [vmem:[#allocation3 + $0x20] ss:$8 sps:$4 sm:$0xff]   ;;  %v1619_v29 = vld [vmem:[#allocation3 + $0x34] ss:$8 sps:$4 sm:$0xff]   ;;  %v1623_v31 = vld [vmem:[#allocation3 + $0x30] ss:$8 sps:$4 sm:$0xff]  }
  0x27   :  { %696 = vmatpush1.bf16.msra.mxu0 %v1587_v3  ;;  %1563 = vmatpush1.bf16.msra.mxu1 %v1587_v3  ;;  %v1618_v28 = vld [vmem:[#allocation3 + $0x120] ss:$8 sps:$4 sm:$0xff]   ;;  %v1621_v30 = vld [vmem:[#allocation3 + $0x134] ss:$8 sps:$4 sm:$0xff]   ;;  %v1624_v32 = vld [vmem:[#allocation3 + $0x130] ss:$8 sps:$4 sm:$0xff]  }
  0x28   :  { %697 = vmatprep.subr.bf16.mxu0 %v1769_v0  ;;  %1548 = vmatprep.subr.bf16.mxu1 %v1769_v0  ;;  %v1625_v33 = vld [vmem:[#allocation3 + $0x44] ss:$8 sps:$4 sm:$0xff]   ;;  %v1629_v35 = vld [vmem:[#allocation3 + $0x40] ss:$8 sps:$4 sm:$0xff]   ;;  %v1631_v37 = vld [vmem:[#allocation3 + $0x54] ss:$8 sps:$4 sm:$0xff]  }
  0x29   :  { %v1627_v34 = vld [vmem:[#allocation3 + $0x144] ss:$8 sps:$4 sm:$0xff]   ;;  %v1630_v36 = vld [vmem:[#allocation3 + $0x140] ss:$8 sps:$4 sm:$0xff]   ;;  %v1633_v38 = vld [vmem:[#allocation3 + $0x154] ss:$8 sps:$4 sm:$0xff]  }
  0x2a   :  { %v1635_v39 = vld [vmem:[#allocation3 + $0x50] ss:$8 sps:$4 sm:$0xff]   ;;  %v1637_v41 = vld [vmem:[#allocation3 + $0x64] ss:$8 sps:$4 sm:$0xff]   ;;  %v1641_v43 = vld [vmem:[#allocation3 + $0x60] ss:$8 sps:$4 sm:$0xff]  }
  0x2b   :  { %698 = vmatpush1.bf16.msra.mxu0 %v1588_v4  ;;  %1564 = vmatpush1.bf16.msra.mxu1 %v1588_v4  ;;  %v1636_v40 = vld [vmem:[#allocation3 + $0x150] ss:$8 sps:$4 sm:$0xff]   ;;  %v1639_v42 = vld [vmem:[#allocation3 + $0x164] ss:$8 sps:$4 sm:$0xff]   ;;  %v1642_v44 = vld [vmem:[#allocation3 + $0x160] ss:$8 sps:$4 sm:$0xff]  }
  0x2c   :  { %699 = vmatprep.subr.bf16.mxu0 %v1769_v0  ;;  %1549 = vmatprep.subr.bf16.mxu1 %v1769_v0  ;;  %v1643_v45 = vld [vmem:[#allocation3 + $0x74] ss:$8 sps:$4 sm:$0xff]   ;;  %v1647_v47 = vld [vmem:[#allocation3 + $0x70] ss:$8 sps:$4 sm:$0xff]   ;;  %v1649_v49 = vld [vmem:[#allocation3 + $0x84] ss:$8 sps:$4 sm:$0xff]  }
  0x2d   :  { %v1645_v46 = vld [vmem:[#allocation3 + $0x174] ss:$8 sps:$4 sm:$0xff]   ;;  %v1648_v48 = vld [vmem:[#allocation3 + $0x170] ss:$8 sps:$4 sm:$0xff]   ;;  %v1651_v50 = vld [vmem:[#allocation3 + $0x184] ss:$8 sps:$4 sm:$0xff]  }
  0x2e   :  { %v1653_v51 = vld [vmem:[#allocation3 + $0x80] ss:$8 sps:$4 sm:$0xff]   ;;  %v1655_v53 = vld [vmem:[#allocation3 + $0x94] ss:$8 sps:$4 sm:$0xff]   ;;  %v1659_v55 = vld [vmem:[#allocation3 + $0x90] ss:$8 sps:$4 sm:$0xff]  }
  0x2f   :  { %700 = vmatpush1.bf16.msra.mxu0 %v1589_v5  ;;  %1565 = vmatpush1.bf16.msra.mxu1 %v1589_v5  ;;  %v1654_v52 = vld [vmem:[#allocation3 + $0x180] ss:$8 sps:$4 sm:$0xff]   ;;  %v1657_v54 = vld [vmem:[#allocation3 + $0x194] ss:$8 sps:$4 sm:$0xff]   ;;  %v1660_v56 = vld [vmem:[#allocation3 + $0x190] ss:$8 sps:$4 sm:$0xff]  }
  0x30   :  { %701 = vmatprep.subr.bf16.mxu0 %v1769_v0  ;;  %1550 = vmatprep.subr.bf16.mxu1 %v1769_v0  ;;  %v1661_v57 = vld [vmem:[#allocation3 + $0xa4] ss:$8 sps:$4 sm:$0xff]   ;;  %v1665_v59 = vld [vmem:[#allocation3 + $0xa0] ss:$8 sps:$4 sm:$0xff]   ;;  %v1667_v61 = vld [vmem:[#allocation3 + $0xb4] ss:$8 sps:$4 sm:$0xff]  }
  0x31   :  { %v1663_v58 = vld [vmem:[#allocation3 + $0x1a4] ss:$8 sps:$4 sm:$0xff]   ;;  %v1666_v60 = vld [vmem:[#allocation3 + $0x1a0] ss:$8 sps:$4 sm:$0xff]   ;;  %v1669_v62 = vld [vmem:[#allocation3 + $0x1b4] ss:$8 sps:$4 sm:$0xff]  }
  0x32   :  { %v1671_v63 = vld [vmem:[#allocation3 + $0xb0] ss:$8 sps:$4 sm:$0xff]   ;;  %v1673_v1 = vld [vmem:[#allocation3 + $0xc4] ss:$8 sps:$4 sm:$0xff]   ;;  %v1677_v3 = vld [vmem:[#allocation3 + $0xc0] ss:$8 sps:$4 sm:$0xff]  }
  0x33   :  { %702 = vmatpush1.bf16.msra.mxu0 %v1590_v7  ;;  %1566 = vmatpush1.bf16.msra.mxu1 %v1590_v7  ;;  %v1675_v2 = vld [vmem:[#allocation3 + $0x1c4] ss:$8 sps:$4 sm:$0xff]   ;;  %v1678_v4 = vld [vmem:[#allocation3 + $0x1c0] ss:$8 sps:$4 sm:$0xff]   ;;  %v1679_v5 = vld [vmem:[#allocation3 + $0xd4] ss:$8 sps:$4 sm:$0xff]  }
  0x34   :  { %703 = vmatprep.subr.bf16.mxu0 %v1769_v0  ;;  %1551 = vmatprep.subr.bf16.mxu1 %v1769_v0  ;;  %v1681_v6 = vld [vmem:[#allocation3 + $0x1d4] ss:$8 sps:$4 sm:$0xff]   ;;  %v1683_v7 = vld [vmem:[#allocation3 + $0xd0] ss:$8 sps:$4 sm:$0xff]  }
  0x35   :  { %v1684_v8 = vld [vmem:[#allocation3 + $0x1d0] ss:$8 sps:$4 sm:$0xff]  }
  0x37   :  { %704 = vmatpush1.bf16.msra.mxu0 %v1591_v9  ;;  %1567 = vmatpush1.bf16.msra.mxu1 %v1591_v9  ;;  %v1685_v9 = vld [vmem:[#allocation3 + $0xe4] ss:$8 sps:$4 sm:$0xff]  }
  0x38   :  { %705 = vmatprep.subr.bf16.mxu0 %v1769_v0  ;;  %1552 = vmatprep.subr.bf16.mxu1 %v1769_v0 }
  0x3b   :  { %706 = vmatpush1.bf16.msra.mxu0 %v1592_v10  ;;  %1568 = vmatpush1.bf16.msra.mxu1 %v1592_v10  ;;  %v1687_v10 = vld [vmem:[#allocation3 + $0x1e4] ss:$8 sps:$4 sm:$0xff]  }
  0x3c   :  { %707 = vmatprep.subr.bf16.mxu0 %v1769_v0  ;;  %1553 = vmatprep.subr.bf16.mxu1 %v1769_v0 }
  0x3f   :  { %708 = vmatpush2.bf16.msra.mxu0 %v1593_v11  ;;  %1569 = vmatpush2.bf16.msra.mxu1 %v1593_v11  ;;  %v1689_v11 = vld [vmem:[#allocation3 + $0xe0] ss:$8 sps:$4 sm:$0xff]  }
  0x40   :  { %709 = vmatprep.subr.bf16.mxu0 %v1769_v0  ;;  %1554 = vmatprep.subr.bf16.mxu1 %v1769_v0 }
  0x43   :  { %710 = vmatpush2.bf16.msra.mxu0 %v1594_v12  ;;  %1570 = vmatpush2.bf16.msra.mxu1 %v1594_v12  ;;  %v1690_v12 = vld [vmem:[#allocation3 + $0x1e0] ss:$8 sps:$4 sm:$0xff]  }
  0x44   :  { %711 = vmatprep.subr.bf16.mxu0 %v1769_v0  ;;  %1555 = vmatprep.subr.bf16.mxu1 %v1769_v0 }
  0x47   :  { %712 = vmatpush2.bf16.msra.mxu0 %v1595_v13  ;;  %1571 = vmatpush2.bf16.msra.mxu1 %v1595_v13  ;;  %v1691_v13 = vld [vmem:[#allocation3 + $0xf4] ss:$8 sps:$4 sm:$0xff]  }
  0x48   :  { %713 = vmatprep.subr.bf16.mxu0 %v1769_v0  ;;  %1556 = vmatprep.subr.bf16.mxu1 %v1769_v0 }
  0x4b   :  { %714 = vmatpush2.bf16.msra.mxu0 %v1596_v14  ;;  %1572 = vmatpush2.bf16.msra.mxu1 %v1596_v14  ;;  %v1693_v14 = vld [vmem:[#allocation3 + $0x1f4] ss:$8 sps:$4 sm:$0xff]  }
  0x4c   :  { %715 = vmatprep.subr.bf16.mxu0 %v1769_v0  ;;  %1557 = vmatprep.subr.bf16.mxu1 %v1769_v0 }
  0x4f   :  { %716 = vmatpush2.bf16.msra.mxu0 %v1597_v15  ;;  %1573 = vmatpush2.bf16.msra.mxu1 %v1597_v15  ;;  %v1695_v15 = vld [vmem:[#allocation3 + $0xf0] ss:$8 sps:$4 sm:$0xff]  }
  0x50   :  { %717 = vmatprep.subr.bf16.mxu0 %v1769_v0  ;;  %1558 = vmatprep.subr.bf16.mxu1 %v1769_v0 }
  0x53   :  { %718 = vmatpush2.bf16.msra.mxu0 %v1598_v16  ;;  %1574 = vmatpush2.bf16.msra.mxu1 %v1598_v16  ;;  %v1696_v16 = vld [vmem:[#allocation3 + $0x1f0] ss:$8 sps:$4 sm:$0xff]  }
  0x54   :  { %719 = vmatprep.subr.bf16.mxu0 %v1769_v0  ;;  %1559 = vmatprep.subr.bf16.mxu1 %v1769_v0 }
  0x57   :  { %720 = vmatpush2.bf16.msra.mxu0 %v1599_v17  ;;  %1575 = vmatpush2.bf16.msra.mxu1 %v1599_v17  ;;  %v1840_v17 = vld [vmem:[%s1983_s2] ss:$0 sm:$0xff]  ;;  %s1770_s2 = smov [#allocation8]  }
  0x58   :  { %721 = vmatprep.subr.bf16.mxu0 %v1769_v0  ;;  %1560 = vmatprep.subr.bf16.mxu1 %v1769_v0  ;;  %v1672_v0 = vld [vmem:[#allocation3 + $0x1b0] ss:$8 sps:$4 sm:$0xff]  }
  0x5b   :  { %722 = vmatpush2.bf16.msra.mxu0 %v1600_v18  ;;  %1576 = vmatpush2.bf16.msra.mxu1 %v1600_v18 }
  0x5e   :  { %724 = vmatmul.mubr.bf16.vlgmr.msra.gmra.mxu0 %v1601_v19  ;;  %852 = vmatmul.mubr.bf16.vlgmr.msra.gmra.mxu1 %v1604_v20  ;;  %v1845_v19 = vld [vmem:[%s1984_s3] ss:$0 sm:$0xff]  ;;  %s1450_s3 = sshll.u32 %s1770_s2, 4  ;;  %s1451_s3 = int_to_ptr.vmem [resolvable:$true] %s1450_s3 }
  0x5f   :  { %731 = vmatprep.mubr.bf16.mxu0 %v1607_v21  ;;  %859 = vmatprep.mubr.bf16.mxu1 %v1609_v22  ;;  %s1737_s5 = scalar_lea.vmem %s1451_s3, 8192  ;;  %p1742_p11 = scmp.lt.s32.totalorder %s1451_s3, %s1451_s3 }
  0x60   :  { %p1738_p10 = scmp.ne.s32.totalorder %s1451_s3, %s1737_s5  ;;  %p1743_p12 = scmp.lt.s32.totalorder %s1737_s5, %s1737_s5 }
  0x62   :  { %p1744_p13 = por %p1743_p12, %p1742_p11 }
  0x64   :  { %p1745_p0 = pnand %p1744_p13, %p1738_p10 }
  0x66   :  { %732 = vmatmul.mubr.bf16.gmra.mxu0 %v1611_v23  ;;  %860 = vmatmul.mubr.bf16.gmra.mxu1 %v1612_v24 }
  0x67   :  { %739 = vmatprep.mubr.bf16.mxu0 %v1613_v25  ;;  %867 = vmatprep.mubr.bf16.mxu1 %v1615_v26 }
  0x6e   :  { %740 = vmatmul.mubr.bf16.gmra.mxu0 %v1617_v27  ;;  %868 = vmatmul.mubr.bf16.gmra.mxu1 %v1618_v28 }
  0x6f   :  { %747 = vmatprep.mubr.bf16.mxu0 %v1619_v29  ;;  %875 = vmatprep.mubr.bf16.mxu1 %v1621_v30 }
  0x76   :  { %748 = vmatmul.mubr.bf16.gmra.mxu0 %v1623_v31  ;;  %876 = vmatmul.mubr.bf16.gmra.mxu1 %v1624_v32 }
  0x77   :  { %755 = vmatprep.mubr.bf16.mxu0 %v1625_v33  ;;  %883 = vmatprep.mubr.bf16.mxu1 %v1627_v34 }
  0x7e   :  { %756 = vmatmul.mubr.bf16.gmra.mxu0 %v1629_v35  ;;  %884 = vmatmul.mubr.bf16.gmra.mxu1 %v1630_v36 }
  0x7f   :  { %763 = vmatprep.mubr.bf16.mxu0 %v1631_v37  ;;  %891 = vmatprep.mubr.bf16.mxu1 %v1633_v38 }
  0x86   :  { %764 = vmatmul.mubr.bf16.gmra.mxu0 %v1635_v39  ;;  %892 = vmatmul.mubr.bf16.gmra.mxu1 %v1636_v40 }
  0x87   :  { %771 = vmatprep.mubr.bf16.mxu0 %v1637_v41  ;;  %899 = vmatprep.mubr.bf16.mxu1 %v1639_v42 }
  0x8e   :  { %772 = vmatmul.mubr.bf16.gmra.mxu0 %v1641_v43  ;;  %900 = vmatmul.mubr.bf16.gmra.mxu1 %v1642_v44 }
  0x8f   :  { %779 = vmatprep.mubr.bf16.mxu0 %v1643_v45  ;;  %907 = vmatprep.mubr.bf16.mxu1 %v1645_v46 }
  0x96   :  { %780 = vmatmul.mubr.bf16.gmra.mxu0 %v1647_v47  ;;  %908 = vmatmul.mubr.bf16.gmra.mxu1 %v1648_v48 }
  0x97   :  { %787 = vmatprep.mubr.bf16.mxu0 %v1649_v49  ;;  %915 = vmatprep.mubr.bf16.mxu1 %v1651_v50 }
  0x9e   :  { %788 = vmatmul.mubr.bf16.gmra.mxu0 %v1653_v51  ;;  %916 = vmatmul.mubr.bf16.gmra.mxu1 %v1654_v52 }
  0x9f   :  { %795 = vmatprep.mubr.bf16.mxu0 %v1655_v53  ;;  %923 = vmatprep.mubr.bf16.mxu1 %v1657_v54 }
  0xa6   :  { %796 = vmatmul.mubr.bf16.gmra.mxu0 %v1659_v55  ;;  %924 = vmatmul.mubr.bf16.gmra.mxu1 %v1660_v56 }
  0xa7   :  { %803 = vmatprep.mubr.bf16.mxu0 %v1661_v57  ;;  %931 = vmatprep.mubr.bf16.mxu1 %v1663_v58 }
  0xae   :  { %804 = vmatmul.mubr.bf16.gmra.mxu0 %v1665_v59  ;;  %932 = vmatmul.mubr.bf16.gmra.mxu1 %v1666_v60 }
  0xaf   :  { %811 = vmatprep.mubr.bf16.mxu0 %v1667_v61  ;;  %939 = vmatprep.mubr.bf16.mxu1 %v1669_v62 }
  0xb6   :  { %812 = vmatmul.mubr.bf16.gmra.mxu0 %v1671_v63  ;;  %940 = vmatmul.mubr.bf16.gmra.mxu1 %v1672_v0 }
  0xb7   :  { %819 = vmatprep.mubr.bf16.mxu0 %v1673_v1  ;;  %947 = vmatprep.mubr.bf16.mxu1 %v1675_v2 }
  0xbe   :  { %820 = vmatmul.mubr.bf16.gmra.mxu0 %v1677_v3  ;;  %948 = vmatmul.mubr.bf16.gmra.mxu1 %v1678_v4 }
  0xbf   :  { %827 = vmatprep.mubr.bf16.mxu0 %v1679_v5  ;;  %955 = vmatprep.mubr.bf16.mxu1 %v1681_v6 }
  0xc6   :  { %828 = vmatmul.mubr.bf16.gmra.mxu0 %v1683_v7  ;;  %956 = vmatmul.mubr.bf16.gmra.mxu1 %v1684_v8 }
  0xc7   :  { %835 = vmatprep.mubr.bf16.mxu0 %v1685_v9  ;;  %963 = vmatprep.mubr.bf16.mxu1 %v1687_v10 }
  0xce   :  { %836 = vmatmul.mubr.bf16.gmra.mxu0 %v1689_v11  ;;  %964 = vmatmul.mubr.bf16.gmra.mxu1 %v1690_v12 }
  0xcf   :  { %843 = vmatprep.mubr.bf16.mxu0 %v1691_v13  ;;  %971 = vmatprep.mubr.bf16.mxu1 %v1693_v14 }
  0xd6   :  { %844 = vmatmul.mubr.bf16.gmra.mxu0 %v1695_v15  ;;  %972 = vmatmul.mubr.bf16.gmra.mxu1 %v1696_v16 }
 0x11e   :  { %v725_v18 = vpop.f32.mrf.mxu0  ;;  %v853_v20 = vpop.f32.mrf.mxu1 }
 0x11f   :  { %v1182_v21 = vmul.f32 %v1840_v17, %v725_v18  ;;  %v1214_v22 = vmul.f32 %v1840_v17, %v853_v20 }
 0x120   :  { %v727_v23 = vpop.f32.mrf.mxu0  ;;  %v855_v24 = vpop.f32.mrf.mxu1 }
 0x121   :  { %v1253_v25 = vadd.f32 %v1845_v19, %v1182_v21  ;;  %v1285_v26 = vadd.f32 %v1845_v19, %v1214_v22 }
 0x122   :  { %v728_v27 = vpop.f32.mrf.mxu0  ;;  %v856_v28 = vpop.f32.mrf.mxu1 }
 0x123   :  { %v1317_v29 = vmax.f32 %v1253_v25, 0.0  ;;  %v1349_v30 = vmax.f32 %v1285_v26, 0.0  ;;  %v1183_v31 = vmul.f32 %v1840_v17, %v728_v27  ;;  %v1215_v32 = vmul.f32 %v1840_v17, %v856_v28 }
 0x124   :  { %v730_v33 = vpop.f32.mrf.mxu0  ;;  %v858_v34 = vpop.f32.mrf.mxu1 }
 0x125   :  { %1381 = vst [vmem:[#allocation8] sm:$0xff] %v1317_v29  ;;  %1413 = vst [vmem:[#allocation8 + $0x100] sm:$0xff] %v1349_v30  ;;  %v1254_v35 = vadd.f32 %v1845_v19, %v1183_v31  ;;  %v1286_v36 = vadd.f32 %v1845_v19, %v1215_v32 }
 0x126   :  { %v733_v37 = vpop.f32.mrf.mxu0  ;;  %v861_v38 = vpop.f32.mrf.mxu1 }
 0x127   :  { %v1318_v39 = vmax.f32 %v1254_v35, 0.0  ;;  %v1350_v40 = vmax.f32 %v1286_v36, 0.0  ;;  %v1184_v41 = vmul.f32 %v1840_v17, %v733_v37  ;;  %v1216_v42 = vmul.f32 %v1840_v17, %v861_v38 }
 0x128   :  { %v735_v43 = vpop.f32.mrf.mxu0  ;;  %v863_v44 = vpop.f32.mrf.mxu1 }
 0x129   :  { %1382 = vst [vmem:[#allocation8 + $0x8] sm:$0xff] %v1318_v39  ;;  %1414 = vst [vmem:[#allocation8 + $0x108] sm:$0xff] %v1350_v40  ;;  %v1255_v45 = vadd.f32 %v1845_v19, %v1184_v41  ;;  %v1287_v46 = vadd.f32 %v1845_v19, %v1216_v42 }
 0x12a   :  { %v736_v47 = vpop.f32.mrf.mxu0  ;;  %v864_v48 = vpop.f32.mrf.mxu1 }
 0x12b   :  { %v1319_v49 = vmax.f32 %v1255_v45, 0.0  ;;  %v1351_v50 = vmax.f32 %v1287_v46, 0.0  ;;  %v1185_v51 = vmul.f32 %v1840_v17, %v736_v47  ;;  %v1217_v52 = vmul.f32 %v1840_v17, %v864_v48 }
 0x12c   :  { %v738_v53 = vpop.f32.mrf.mxu0  ;;  %v866_v54 = vpop.f32.mrf.mxu1 }
 0x12d   :  { %1383 = vst [vmem:[#allocation8 + $0x10] sm:$0xff] %v1319_v49  ;;  %1415 = vst [vmem:[#allocation8 + $0x110] sm:$0xff] %v1351_v50  ;;  %v1256_v55 = vadd.f32 %v1845_v19, %v1185_v51  ;;  %v1288_v56 = vadd.f32 %v1845_v19, %v1217_v52 }
 0x12e   :  { %v741_v57 = vpop.f32.mrf.mxu0  ;;  %v869_v58 = vpop.f32.mrf.mxu1 }
 0x12f   :  { %v1320_v59 = vmax.f32 %v1256_v55, 0.0  ;;  %v1352_v60 = vmax.f32 %v1288_v56, 0.0  ;;  %v1186_v61 = vmul.f32 %v1840_v17, %v741_v57  ;;  %v1218_v62 = vmul.f32 %v1840_v17, %v869_v58 }
 0x130   :  { %v743_v63 = vpop.f32.mrf.mxu0  ;;  %v871_v0 = vpop.f32.mrf.mxu1 }
 0x131   :  { %1384 = vst [vmem:[#allocation8 + $0x18] sm:$0xff] %v1320_v59  ;;  %1416 = vst [vmem:[#allocation8 + $0x118] sm:$0xff] %v1352_v60  ;;  %v1257_v1 = vadd.f32 %v1845_v19, %v1186_v61  ;;  %v1289_v2 = vadd.f32 %v1845_v19, %v1218_v62 }
 0x132   :  { %v744_v3 = vpop.f32.mrf.mxu0  ;;  %v872_v4 = vpop.f32.mrf.mxu1 }
 0x133   :  { %v1321_v5 = vmax.f32 %v1257_v1, 0.0  ;;  %v1353_v6 = vmax.f32 %v1289_v2, 0.0  ;;  %v1187_v7 = vmul.f32 %v1840_v17, %v744_v3  ;;  %v1219_v8 = vmul.f32 %v1840_v17, %v872_v4 }
 0x134   :  { %v746_v9 = vpop.f32.mrf.mxu0  ;;  %v874_v10 = vpop.f32.mrf.mxu1 }
 0x135   :  { %1385 = vst [vmem:[#allocation8 + $0x20] sm:$0xff] %v1321_v5  ;;  %1417 = vst [vmem:[#allocation8 + $0x120] sm:$0xff] %v1353_v6  ;;  %v1258_v11 = vadd.f32 %v1845_v19, %v1187_v7  ;;  %v1290_v12 = vadd.f32 %v1845_v19, %v1219_v8 }
 0x136   :  { %v749_v13 = vpop.f32.mrf.mxu0  ;;  %v877_v14 = vpop.f32.mrf.mxu1 }
 0x137   :  { %v1322_v15 = vmax.f32 %v1258_v11, 0.0  ;;  %v1354_v16 = vmax.f32 %v1290_v12, 0.0  ;;  %v1188_v18 = vmul.f32 %v1840_v17, %v749_v13  ;;  %v1220_v20 = vmul.f32 %v1840_v17, %v877_v14 }
 0x138   :  { %v751_v21 = vpop.f32.mrf.mxu0  ;;  %v879_v22 = vpop.f32.mrf.mxu1 }
 0x139   :  { %1386 = vst [vmem:[#allocation8 + $0x28] sm:$0xff] %v1322_v15  ;;  %1418 = vst [vmem:[#allocation8 + $0x128] sm:$0xff] %v1354_v16  ;;  %v1259_v23 = vadd.f32 %v1845_v19, %v1188_v18  ;;  %v1291_v24 = vadd.f32 %v1845_v19, %v1220_v20 }
 0x13a   :  { %v752_v25 = vpop.f32.mrf.mxu0  ;;  %v880_v26 = vpop.f32.mrf.mxu1 }
 0x13b   :  { %v1323_v27 = vmax.f32 %v1259_v23, 0.0  ;;  %v1355_v28 = vmax.f32 %v1291_v24, 0.0  ;;  %v1189_v29 = vmul.f32 %v1840_v17, %v752_v25  ;;  %v1221_v30 = vmul.f32 %v1840_v17, %v880_v26 }
 0x13c   :  { %v754_v31 = vpop.f32.mrf.mxu0  ;;  %v882_v32 = vpop.f32.mrf.mxu1 }
 0x13d   :  { %1387 = vst [vmem:[#allocation8 + $0x30] sm:$0xff] %v1323_v27  ;;  %1419 = vst [vmem:[#allocation8 + $0x130] sm:$0xff] %v1355_v28  ;;  %v1260_v33 = vadd.f32 %v1845_v19, %v1189_v29  ;;  %v1292_v34 = vadd.f32 %v1845_v19, %v1221_v30 }
 0x13e   :  { %v757_v35 = vpop.f32.mrf.mxu0  ;;  %v885_v36 = vpop.f32.mrf.mxu1 }
 0x13f   :  { %v1324_v37 = vmax.f32 %v1260_v33, 0.0  ;;  %v1356_v38 = vmax.f32 %v1292_v34, 0.0  ;;  %v1190_v39 = vmul.f32 %v1840_v17, %v757_v35  ;;  %v1222_v40 = vmul.f32 %v1840_v17, %v885_v36 }
 0x140   :  { %v759_v41 = vpop.f32.mrf.mxu0  ;;  %v887_v42 = vpop.f32.mrf.mxu1 }
 0x141   :  { %1388 = vst [vmem:[#allocation8 + $0x38] sm:$0xff] %v1324_v37  ;;  %1420 = vst [vmem:[#allocation8 + $0x138] sm:$0xff] %v1356_v38  ;;  %v1261_v43 = vadd.f32 %v1845_v19, %v1190_v39  ;;  %v1293_v44 = vadd.f32 %v1845_v19, %v1222_v40 }
 0x142   :  { %v760_v45 = vpop.f32.mrf.mxu0  ;;  %v888_v46 = vpop.f32.mrf.mxu1 }
 0x143   :  { %v1325_v47 = vmax.f32 %v1261_v43, 0.0  ;;  %v1357_v48 = vmax.f32 %v1293_v44, 0.0  ;;  %v1191_v49 = vmul.f32 %v1840_v17, %v760_v45  ;;  %v1223_v50 = vmul.f32 %v1840_v17, %v888_v46 }
 0x144   :  { %v762_v51 = vpop.f32.mrf.mxu0  ;;  %v890_v52 = vpop.f32.mrf.mxu1 }
 0x145   :  { %1389 = vst [vmem:[#allocation8 + $0x40] sm:$0xff] %v1325_v47  ;;  %1421 = vst [vmem:[#allocation8 + $0x140] sm:$0xff] %v1357_v48  ;;  %v1262_v53 = vadd.f32 %v1845_v19, %v1191_v49  ;;  %v1294_v54 = vadd.f32 %v1845_v19, %v1223_v50 }
 0x146   :  { %v765_v55 = vpop.f32.mrf.mxu0  ;;  %v893_v56 = vpop.f32.mrf.mxu1 }
 0x147   :  { %v1326_v57 = vmax.f32 %v1262_v53, 0.0  ;;  %v1358_v58 = vmax.f32 %v1294_v54, 0.0  ;;  %v1192_v59 = vmul.f32 %v1840_v17, %v765_v55  ;;  %v1224_v60 = vmul.f32 %v1840_v17, %v893_v56 }
 0x148   :  { %v767_v61 = vpop.f32.mrf.mxu0  ;;  %v895_v62 = vpop.f32.mrf.mxu1 }
 0x149   :  { %1390 = vst [vmem:[#allocation8 + $0x48] sm:$0xff] %v1326_v57  ;;  %1422 = vst [vmem:[#allocation8 + $0x148] sm:$0xff] %v1358_v58  ;;  %v1263_v63 = vadd.f32 %v1845_v19, %v1192_v59  ;;  %v1295_v0 = vadd.f32 %v1845_v19, %v1224_v60 }
 0x14a   :  { %v768_v1 = vpop.f32.mrf.mxu0  ;;  %v896_v2 = vpop.f32.mrf.mxu1 }
 0x14b   :  { %v1327_v3 = vmax.f32 %v1263_v63, 0.0  ;;  %v1359_v4 = vmax.f32 %v1295_v0, 0.0  ;;  %v1193_v5 = vmul.f32 %v1840_v17, %v768_v1  ;;  %v1225_v6 = vmul.f32 %v1840_v17, %v896_v2 }
 0x14c   :  { %v770_v7 = vpop.f32.mrf.mxu0  ;;  %v898_v8 = vpop.f32.mrf.mxu1 }
 0x14d   :  { %1391 = vst [vmem:[#allocation8 + $0x50] sm:$0xff] %v1327_v3  ;;  %1423 = vst [vmem:[#allocation8 + $0x150] sm:$0xff] %v1359_v4  ;;  %v1264_v9 = vadd.f32 %v1845_v19, %v1193_v5  ;;  %v1296_v10 = vadd.f32 %v1845_v19, %v1225_v6 }
 0x14e   :  { %v773_v11 = vpop.f32.mrf.mxu0  ;;  %v901_v12 = vpop.f32.mrf.mxu1 }
 0x14f   :  { %v1328_v13 = vmax.f32 %v1264_v9, 0.0  ;;  %v1360_v14 = vmax.f32 %v1296_v10, 0.0  ;;  %v1194_v15 = vmul.f32 %v1840_v17, %v773_v11  ;;  %v1226_v16 = vmul.f32 %v1840_v17, %v901_v12 }
 0x150   :  { %v775_v18 = vpop.f32.mrf.mxu0  ;;  %v903_v20 = vpop.f32.mrf.mxu1 }
 0x151   :  { %1392 = vst [vmem:[#allocation8 + $0x58] sm:$0xff] %v1328_v13  ;;  %1424 = vst [vmem:[#allocation8 + $0x158] sm:$0xff] %v1360_v14  ;;  %v1265_v21 = vadd.f32 %v1845_v19, %v1194_v15  ;;  %v1297_v22 = vadd.f32 %v1845_v19, %v1226_v16 }
 0x152   :  { %v776_v23 = vpop.f32.mrf.mxu0  ;;  %v904_v24 = vpop.f32.mrf.mxu1 }
 0x153   :  { %v1329_v25 = vmax.f32 %v1265_v21, 0.0  ;;  %v1361_v26 = vmax.f32 %v1297_v22, 0.0  ;;  %v1195_v27 = vmul.f32 %v1840_v17, %v776_v23  ;;  %v1227_v28 = vmul.f32 %v1840_v17, %v904_v24 }
 0x154   :  { %v778_v29 = vpop.f32.mrf.mxu0  ;;  %v906_v30 = vpop.f32.mrf.mxu1 }
 0x155   :  { %1393 = vst [vmem:[#allocation8 + $0x60] sm:$0xff] %v1329_v25  ;;  %1425 = vst [vmem:[#allocation8 + $0x160] sm:$0xff] %v1361_v26  ;;  %v1266_v31 = vadd.f32 %v1845_v19, %v1195_v27  ;;  %v1298_v32 = vadd.f32 %v1845_v19, %v1227_v28 }
 0x156   :  { %v781_v33 = vpop.f32.mrf.mxu0  ;;  %v909_v34 = vpop.f32.mrf.mxu1 }
 0x157   :  { %v1330_v35 = vmax.f32 %v1266_v31, 0.0  ;;  %v1362_v36 = vmax.f32 %v1298_v32, 0.0  ;;  %v1196_v37 = vmul.f32 %v1840_v17, %v781_v33  ;;  %v1228_v38 = vmul.f32 %v1840_v17, %v909_v34 }
 0x158   :  { %v783_v39 = vpop.f32.mrf.mxu0  ;;  %v911_v40 = vpop.f32.mrf.mxu1 }
 0x159   :  { %1394 = vst [vmem:[#allocation8 + $0x68] sm:$0xff] %v1330_v35  ;;  %1426 = vst [vmem:[#allocation8 + $0x168] sm:$0xff] %v1362_v36  ;;  %v1267_v41 = vadd.f32 %v1845_v19, %v1196_v37  ;;  %v1299_v42 = vadd.f32 %v1845_v19, %v1228_v38 }
 0x15a   :  { %v784_v43 = vpop.f32.mrf.mxu0  ;;  %v912_v44 = vpop.f32.mrf.mxu1 }
 0x15b   :  { %v1331_v45 = vmax.f32 %v1267_v41, 0.0  ;;  %v1363_v46 = vmax.f32 %v1299_v42, 0.0  ;;  %v1197_v47 = vmul.f32 %v1840_v17, %v784_v43  ;;  %v1229_v48 = vmul.f32 %v1840_v17, %v912_v44 }
 0x15c   :  { %v786_v49 = vpop.f32.mrf.mxu0  ;;  %v914_v50 = vpop.f32.mrf.mxu1 }
 0x15d   :  { %1395 = vst [vmem:[#allocation8 + $0x70] sm:$0xff] %v1331_v45  ;;  %1427 = vst [vmem:[#allocation8 + $0x170] sm:$0xff] %v1363_v46  ;;  %v1268_v51 = vadd.f32 %v1845_v19, %v1197_v47  ;;  %v1300_v52 = vadd.f32 %v1845_v19, %v1229_v48 }
 0x15e   :  { %v789_v53 = vpop.f32.mrf.mxu0  ;;  %v917_v54 = vpop.f32.mrf.mxu1 }
 0x15f   :  { %v1332_v55 = vmax.f32 %v1268_v51, 0.0  ;;  %v1364_v56 = vmax.f32 %v1300_v52, 0.0  ;;  %v1198_v57 = vmul.f32 %v1840_v17, %v789_v53  ;;  %v1230_v58 = vmul.f32 %v1840_v17, %v917_v54 }
 0x160   :  { %v791_v59 = vpop.f32.mrf.mxu0  ;;  %v919_v60 = vpop.f32.mrf.mxu1 }
 0x161   :  { %1396 = vst [vmem:[#allocation8 + $0x78] sm:$0xff] %v1332_v55  ;;  %1428 = vst [vmem:[#allocation8 + $0x178] sm:$0xff] %v1364_v56  ;;  %v1269_v61 = vadd.f32 %v1845_v19, %v1198_v57  ;;  %v1301_v62 = vadd.f32 %v1845_v19, %v1230_v58 }
 0x162   :  { %v792_v63 = vpop.f32.mrf.mxu0  ;;  %v920_v0 = vpop.f32.mrf.mxu1 }
 0x163   :  { %v1333_v1 = vmax.f32 %v1269_v61, 0.0  ;;  %v1365_v2 = vmax.f32 %v1301_v62, 0.0  ;;  %v1199_v3 = vmul.f32 %v1840_v17, %v792_v63  ;;  %v1231_v4 = vmul.f32 %v1840_v17, %v920_v0 }
 0x164   :  { %v794_v5 = vpop.f32.mrf.mxu0  ;;  %v922_v6 = vpop.f32.mrf.mxu1 }
 0x165   :  { %1397 = vst [vmem:[#allocation8 + $0x80] sm:$0xff] %v1333_v1  ;;  %1429 = vst [vmem:[#allocation8 + $0x180] sm:$0xff] %v1365_v2  ;;  %v1270_v7 = vadd.f32 %v1845_v19, %v1199_v3  ;;  %v1302_v8 = vadd.f32 %v1845_v19, %v1231_v4 }
 0x166   :  { %v797_v9 = vpop.f32.mrf.mxu0  ;;  %v925_v10 = vpop.f32.mrf.mxu1 }
 0x167   :  { %v1334_v11 = vmax.f32 %v1270_v7, 0.0  ;;  %v1366_v12 = vmax.f32 %v1302_v8, 0.0  ;;  %v1200_v13 = vmul.f32 %v1840_v17, %v797_v9  ;;  %v1232_v14 = vmul.f32 %v1840_v17, %v925_v10 }
 0x168   :  { %v799_v15 = vpop.f32.mrf.mxu0  ;;  %v927_v16 = vpop.f32.mrf.mxu1 }
 0x169   :  { %1398 = vst [vmem:[#allocation8 + $0x88] sm:$0xff] %v1334_v11  ;;  %1430 = vst [vmem:[#allocation8 + $0x188] sm:$0xff] %v1366_v12  ;;  %v1271_v18 = vadd.f32 %v1845_v19, %v1200_v13  ;;  %v1303_v20 = vadd.f32 %v1845_v19, %v1232_v14 }
 0x16a   :  { %v800_v21 = vpop.f32.mrf.mxu0  ;;  %v928_v22 = vpop.f32.mrf.mxu1 }
 0x16b   :  { %v1335_v23 = vmax.f32 %v1271_v18, 0.0  ;;  %v1367_v24 = vmax.f32 %v1303_v20, 0.0  ;;  %v1201_v25 = vmul.f32 %v1840_v17, %v800_v21  ;;  %v1233_v26 = vmul.f32 %v1840_v17, %v928_v22 }
 0x16c   :  { %v802_v27 = vpop.f32.mrf.mxu0  ;;  %v930_v28 = vpop.f32.mrf.mxu1 }
 0x16d   :  { %1399 = vst [vmem:[#allocation8 + $0x90] sm:$0xff] %v1335_v23  ;;  %1431 = vst [vmem:[#allocation8 + $0x190] sm:$0xff] %v1367_v24  ;;  %v1272_v29 = vadd.f32 %v1845_v19, %v1201_v25  ;;  %v1304_v30 = vadd.f32 %v1845_v19, %v1233_v26 }
 0x16e   :  { %v805_v31 = vpop.f32.mrf.mxu0  ;;  %v933_v32 = vpop.f32.mrf.mxu1 }
 0x16f   :  { %v1336_v33 = vmax.f32 %v1272_v29, 0.0  ;;  %v1368_v34 = vmax.f32 %v1304_v30, 0.0  ;;  %v1202_v35 = vmul.f32 %v1840_v17, %v805_v31  ;;  %v1234_v36 = vmul.f32 %v1840_v17, %v933_v32 }
 0x170   :  { %v807_v37 = vpop.f32.mrf.mxu0  ;;  %v935_v38 = vpop.f32.mrf.mxu1 }
 0x171   :  { %1400 = vst [vmem:[#allocation8 + $0x98] sm:$0xff] %v1336_v33  ;;  %1432 = vst [vmem:[#allocation8 + $0x198] sm:$0xff] %v1368_v34  ;;  %v1273_v39 = vadd.f32 %v1845_v19, %v1202_v35  ;;  %v1305_v40 = vadd.f32 %v1845_v19, %v1234_v36 }
 0x172   :  { %v808_v41 = vpop.f32.mrf.mxu0  ;;  %v936_v42 = vpop.f32.mrf.mxu1 }
 0x173   :  { %v1337_v43 = vmax.f32 %v1273_v39, 0.0  ;;  %v1369_v44 = vmax.f32 %v1305_v40, 0.0  ;;  %v1203_v45 = vmul.f32 %v1840_v17, %v808_v41  ;;  %v1235_v46 = vmul.f32 %v1840_v17, %v936_v42 }
 0x174   :  { %v810_v47 = vpop.f32.mrf.mxu0  ;;  %v938_v48 = vpop.f32.mrf.mxu1 }
 0x175   :  { %1401 = vst [vmem:[#allocation8 + $0xa0] sm:$0xff] %v1337_v43  ;;  %1433 = vst [vmem:[#allocation8 + $0x1a0] sm:$0xff] %v1369_v44  ;;  %v1274_v49 = vadd.f32 %v1845_v19, %v1203_v45  ;;  %v1306_v50 = vadd.f32 %v1845_v19, %v1235_v46 }
 0x176   :  { %v813_v51 = vpop.f32.mrf.mxu0  ;;  %v941_v52 = vpop.f32.mrf.mxu1 }
 0x177   :  { %v1338_v53 = vmax.f32 %v1274_v49, 0.0  ;;  %v1370_v54 = vmax.f32 %v1306_v50, 0.0  ;;  %v1204_v55 = vmul.f32 %v1840_v17, %v813_v51  ;;  %v1236_v56 = vmul.f32 %v1840_v17, %v941_v52 }
 0x178   :  { %v815_v57 = vpop.f32.mrf.mxu0  ;;  %v943_v58 = vpop.f32.mrf.mxu1 }
 0x179   :  { %1402 = vst [vmem:[#allocation8 + $0xa8] sm:$0xff] %v1338_v53  ;;  %1434 = vst [vmem:[#allocation8 + $0x1a8] sm:$0xff] %v1370_v54  ;;  %v1275_v59 = vadd.f32 %v1845_v19, %v1204_v55  ;;  %v1307_v60 = vadd.f32 %v1845_v19, %v1236_v56 }
 0x17a   :  { %v816_v61 = vpop.f32.mrf.mxu0  ;;  %v944_v62 = vpop.f32.mrf.mxu1 }
 0x17b   :  { %v1339_v63 = vmax.f32 %v1275_v59, 0.0  ;;  %v1371_v0 = vmax.f32 %v1307_v60, 0.0  ;;  %v1205_v1 = vmul.f32 %v1840_v17, %v816_v61  ;;  %v1237_v2 = vmul.f32 %v1840_v17, %v944_v62 }
 0x17c   :  { %v818_v3 = vpop.f32.mrf.mxu0  ;;  %v946_v4 = vpop.f32.mrf.mxu1 }
 0x17d   :  { %1403 = vst [vmem:[#allocation8 + $0xb0] sm:$0xff] %v1339_v63  ;;  %1435 = vst [vmem:[#allocation8 + $0x1b0] sm:$0xff] %v1371_v0  ;;  %v1276_v5 = vadd.f32 %v1845_v19, %v1205_v1  ;;  %v1308_v6 = vadd.f32 %v1845_v19, %v1237_v2 }
 0x17e   :  { %v821_v7 = vpop.f32.mrf.mxu0  ;;  %v949_v8 = vpop.f32.mrf.mxu1 }
 0x17f   :  { %v1340_v9 = vmax.f32 %v1276_v5, 0.0  ;;  %v1372_v10 = vmax.f32 %v1308_v6, 0.0  ;;  %v1206_v11 = vmul.f32 %v1840_v17, %v821_v7  ;;  %v1238_v12 = vmul.f32 %v1840_v17, %v949_v8 }
 0x180   :  { %v823_v13 = vpop.f32.mrf.mxu0  ;;  %v951_v14 = vpop.f32.mrf.mxu1 }
 0x181   :  { %1404 = vst [vmem:[#allocation8 + $0xb8] sm:$0xff] %v1340_v9  ;;  %1436 = vst [vmem:[#allocation8 + $0x1b8] sm:$0xff] %v1372_v10  ;;  %v1277_v15 = vadd.f32 %v1845_v19, %v1206_v11  ;;  %v1309_v16 = vadd.f32 %v1845_v19, %v1238_v12 }
 0x182   :  { %v824_v18 = vpop.f32.mrf.mxu0  ;;  %v952_v20 = vpop.f32.mrf.mxu1 }
 0x183   :  { %v1341_v21 = vmax.f32 %v1277_v15, 0.0  ;;  %v1373_v22 = vmax.f32 %v1309_v16, 0.0  ;;  %v1207_v23 = vmul.f32 %v1840_v17, %v824_v18  ;;  %v1239_v24 = vmul.f32 %v1840_v17, %v952_v20 }
 0x184   :  { %v826_v25 = vpop.f32.mrf.mxu0  ;;  %v954_v26 = vpop.f32.mrf.mxu1 }
 0x185   :  { %1405 = vst [vmem:[#allocation8 + $0xc0] sm:$0xff] %v1341_v21  ;;  %1437 = vst [vmem:[#allocation8 + $0x1c0] sm:$0xff] %v1373_v22  ;;  %v1278_v27 = vadd.f32 %v1845_v19, %v1207_v23  ;;  %v1310_v28 = vadd.f32 %v1845_v19, %v1239_v24 }
 0x186   :  { %v829_v29 = vpop.f32.mrf.mxu0  ;;  %v957_v30 = vpop.f32.mrf.mxu1 }
 0x187   :  { %v1342_v31 = vmax.f32 %v1278_v27, 0.0  ;;  %v1374_v32 = vmax.f32 %v1310_v28, 0.0  ;;  %v1208_v33 = vmul.f32 %v1840_v17, %v829_v29  ;;  %v1240_v34 = vmul.f32 %v1840_v17, %v957_v30 }
 0x188   :  { %v831_v35 = vpop.f32.mrf.mxu0  ;;  %v959_v36 = vpop.f32.mrf.mxu1 }
 0x189   :  { %1406 = vst [vmem:[#allocation8 + $0xc8] sm:$0xff] %v1342_v31  ;;  %1438 = vst [vmem:[#allocation8 + $0x1c8] sm:$0xff] %v1374_v32  ;;  %v1279_v37 = vadd.f32 %v1845_v19, %v1208_v33  ;;  %v1311_v38 = vadd.f32 %v1845_v19, %v1240_v34 }
 0x18a   :  { %v832_v39 = vpop.f32.mrf.mxu0  ;;  %v960_v40 = vpop.f32.mrf.mxu1 }
 0x18b   :  { %v1343_v41 = vmax.f32 %v1279_v37, 0.0  ;;  %v1375_v42 = vmax.f32 %v1311_v38, 0.0  ;;  %v1209_v43 = vmul.f32 %v1840_v17, %v832_v39  ;;  %v1241_v44 = vmul.f32 %v1840_v17, %v960_v40 }
 0x18c   :  { %v834_v45 = vpop.f32.mrf.mxu0  ;;  %v962_v46 = vpop.f32.mrf.mxu1 }
 0x18d   :  { %1407 = vst [vmem:[#allocation8 + $0xd0] sm:$0xff] %v1343_v41  ;;  %1439 = vst [vmem:[#allocation8 + $0x1d0] sm:$0xff] %v1375_v42  ;;  %v1280_v47 = vadd.f32 %v1845_v19, %v1209_v43  ;;  %v1312_v48 = vadd.f32 %v1845_v19, %v1241_v44 }
 0x18e   :  { %v837_v49 = vpop.f32.mrf.mxu0  ;;  %v965_v50 = vpop.f32.mrf.mxu1 }
 0x18f   :  { %v1344_v51 = vmax.f32 %v1280_v47, 0.0  ;;  %v1376_v52 = vmax.f32 %v1312_v48, 0.0  ;;  %v1210_v53 = vmul.f32 %v1840_v17, %v837_v49  ;;  %v1242_v54 = vmul.f32 %v1840_v17, %v965_v50 }
 0x190   :  { %v839_v55 = vpop.f32.mrf.mxu0  ;;  %v967_v56 = vpop.f32.mrf.mxu1 }
 0x191   :  { %1408 = vst [vmem:[#allocation8 + $0xd8] sm:$0xff] %v1344_v51  ;;  %1440 = vst [vmem:[#allocation8 + $0x1d8] sm:$0xff] %v1376_v52  ;;  %v1281_v57 = vadd.f32 %v1845_v19, %v1210_v53  ;;  %v1313_v58 = vadd.f32 %v1845_v19, %v1242_v54 }
 0x192   :  { %v840_v59 = vpop.f32.mrf.mxu0  ;;  %v968_v60 = vpop.f32.mrf.mxu1 }
 0x193   :  { %v1345_v61 = vmax.f32 %v1281_v57, 0.0  ;;  %v1377_v62 = vmax.f32 %v1313_v58, 0.0  ;;  %v1211_v63 = vmul.f32 %v1840_v17, %v840_v59  ;;  %v1243_v0 = vmul.f32 %v1840_v17, %v968_v60 }
 0x194   :  { %v842_v1 = vpop.f32.mrf.mxu0  ;;  %v970_v2 = vpop.f32.mrf.mxu1 }
 0x195   :  { %1409 = vst [vmem:[#allocation8 + $0xe0] sm:$0xff] %v1345_v61  ;;  %1441 = vst [vmem:[#allocation8 + $0x1e0] sm:$0xff] %v1377_v62  ;;  %v1282_v3 = vadd.f32 %v1845_v19, %v1211_v63  ;;  %v1314_v4 = vadd.f32 %v1845_v19, %v1243_v0 }
 0x196   :  { %v845_v5 = vpop.f32.mrf.mxu0  ;;  %v973_v6 = vpop.f32.mrf.mxu1 }
 0x197   :  { %v1346_v7 = vmax.f32 %v1282_v3, 0.0  ;;  %v1378_v8 = vmax.f32 %v1314_v4, 0.0  ;;  %v1212_v9 = vmul.f32 %v1840_v17, %v845_v5  ;;  %v1244_v10 = vmul.f32 %v1840_v17, %v973_v6 }
 0x198   :  { %v847_v11 = vpop.f32.mrf.mxu0  ;;  %v975_v12 = vpop.f32.mrf.mxu1 }
 0x199   :  { %1410 = vst [vmem:[#allocation8 + $0xe8] sm:$0xff] %v1346_v7  ;;  %1442 = vst [vmem:[#allocation8 + $0x1e8] sm:$0xff] %v1378_v8  ;;  %v1283_v13 = vadd.f32 %v1845_v19, %v1212_v9  ;;  %v1315_v14 = vadd.f32 %v1845_v19, %v1244_v10 }
 0x19a   :  { %v848_v15 = vpop.f32.mrf.mxu0  ;;  %v976_v16 = vpop.f32.mrf.mxu1 }
 0x19b   :  { %v1347_v18 = vmax.f32 %v1283_v13, 0.0  ;;  %v1379_v20 = vmax.f32 %v1315_v14, 0.0  ;;  %v1213_v21 = vmul.f32 %v1840_v17, %v848_v15  ;;  %v1245_v22 = vmul.f32 %v1840_v17, %v976_v16 }
 0x19c   :  { %v850_v23 = vpop.f32.mrf.mxu0  ;;  %v978_v24 = vpop.f32.mrf.mxu1 }
 0x19d   :  { %1411 = vst [vmem:[#allocation8 + $0xf0] sm:$0xff] %v1347_v18  ;;  %1443 = vst [vmem:[#allocation8 + $0x1f0] sm:$0xff] %v1379_v20  ;;  %v1284_v25 = vadd.f32 %v1845_v19, %v1213_v21  ;;  %v1316_v26 = vadd.f32 %v1845_v19, %v1245_v22 }
 0x19f   :  { %v1348_v27 = vmax.f32 %v1284_v25, 0.0  ;;  %v1380_v28 = vmax.f32 %v1316_v26, 0.0 }
 0x1a1   :  { %1412 = vst [vmem:[#allocation8 + $0xf8] sm:$0xff] %v1348_v27  ;;  %1444 = vst [vmem:[#allocation8 + $0x1f8] sm:$0xff] %v1380_v28 }
 0x1a2   :  { %1748 = shalt.err (!%p1745_p0)
}
 0x1a3   :  { %1456 = dma.vmem_to_hbm [thread:$0]  %s1451_s3, 8192, %s1985_s4, [#allocation5], %s1764_s18, %s1764_s18, %s1765_s19  }
 0x1a4   :  { %1761 = dma.done.wait [#allocation5], 8192  }
 0x1a5   :  { %1762 = vsyncadd [#allocation5], 4294959104 }
 0x1a6   :  { %1460 = vsyncpa [#allocation4], 1 }
 0x1a7   :  { %1461 = vsyncpa [#allocation7], 1 }
 0x1a8   :  { %1462 = vsyncpa [#allocation5], 1 }

</bundles_post_ra>
